<compile_context>
chip_gen: v6e
topology: v6e:2x2x1
jax: 0.10.0
libtpu: 0.0.40
codegen_flags: <defaults>
</compile_context>

<pallas_src>
import functools

import jax
import jax.numpy as jnp
from jax.experimental import pallas as pl
from jax.experimental.pallas import tpu as pltpu


def _sdm_region_kernel(x_ref, o_ref, *, compute_dtype):
    # region = 2*sigmoid(5000*relu(x)) - 1  ==  tanh(2500*relu(x))  (exact identity)
    x = x_ref[...].astype(compute_dtype)
    region = jnp.tanh(jnp.maximum(x, 0) * jnp.asarray(2500.0, compute_dtype))
    o_ref[...] = region.astype(o_ref.dtype)


_LANE_CANDIDATES = (2048, 1024, 512, 256, 128)
_FALLBACK_LANE = 512


def _device_kind():
    try:
        return jax.devices()[0].device_kind.lower()
    except Exception:
        return ""


def sdm_region_detector(x):
    """x: (B, C, H, W) float array (NCHW, matching the PyTorch module)."""
    orig_shape = x.shape
    orig_dtype = x.dtype
    n = x.size
    itemsize = jnp.dtype(orig_dtype).itemsize

    kind = _device_kind()
    is_v7 = "v7" in kind
    has_bf16_vpu = ("v6" in kind) or is_v7

    # bf16-native compute where the VPU/EUP support it; f32 otherwise.
    if orig_dtype == jnp.float32 or not has_bf16_vpu:
        compute_dtype = jnp.float32
    else:
        compute_dtype = orig_dtype

    # ---- lane-dense layout: widest lane count dividing n -> no pad, no slice ----
    pad = 0
    lane_width = None
    for lw in _LANE_CANDIDATES:
        if n % lw == 0:
            lane_width = lw
            break
    if lane_width is None:          # rare: nothing divides -> pad to a row multiple
        lane_width = _FALLBACK_LANE
        pad = (-n) % lane_width
    rows = (n + pad) // lane_width

    # ---- block sizing: ~4 MiB/block on v7x, ~2 MiB elsewhere ----
    target_block_bytes = (4 << 20) if is_v7 else (2 << 20)
    br = max(8, target_block_bytes // (lane_width * itemsize))
    br = (br // 8) * 8              # keep (8,128) divisibility when tiling rows
    if br >= rows:
        br = rows                   # full-extent block: legal even if rows % 8 != 0
    grid = (pl.cdiv(rows, br),)     # ragged last block OK (elementwise; OOB stores masked)

    flat = x.reshape(-1)
    if pad:
        flat = jnp.pad(flat, (0, pad))
    x2d = flat.reshape(rows, lane_width)

    if is_v7 and grid[0] >= 2:
        dim_sem = (pltpu.CORE_PARALLEL,)   # shard grid steps across v7x's 2 TensorCores
    else:
        dim_sem = ("parallel",)

    out2d = pl.pallas_call(
        functools.partial(_sdm_region_kernel, compute_dtype=compute_dtype),
        out_shape=jax.ShapeDtypeStruct((rows, lane_width), orig_dtype),
        grid=grid,
        in_specs=[pl.BlockSpec((br, lane_width), lambda i: (i, 0))],
        out_specs=pl.BlockSpec((br, lane_width), lambda i: (i, 0)),
        compiler_params=pltpu.CompilerParams(
            dimension_semantics=dim_sem,
            vmem_limit_bytes=32 * 1024 * 1024,
        ),
    )(x2d)

    if pad:
        return out2d.reshape(-1)[:n].reshape(orig_shape)
    return out2d.reshape(orig_shape)


if __name__ == "__main__":
    # NOTE: k1, k2 in the PyTorch __init__ are unused in forward; no params needed.
    key = jax.random.PRNGKey(0)
    B, C, H, W = 2, 4, 16, 16
    x = jax.random.normal(key, (B, C, H, W), dtype=jnp.float32)

    out = sdm_region_detector(x)
    out = jax.block_until_ready(out)

    # Reference check in plain JAX (same semantics as the PyTorch forward).
    ref = 2.0 * jax.nn.sigmoid(jnp.maximum(x, 0.0) * 5000.0) - 1.0
    assert out.shape == (B, C, H, W)
    assert out.dtype == x.dtype
    assert jnp.allclose(out, ref, atol=1e-5), "mismatch vs reference"

    print("KERNEL_OK")
</pallas_src>

<mosaic_0001>
module attributes {stable_mosaic.version = 11 : i64} {
  func.func @_sdm_region_kernel(%arg0: i32, %arg1: memref<1x2048xf32, #tpu.memory_space<vmem>>, %arg2: memref<1x2048xf32, #tpu.memory_space<vmem>>) attributes {dimension_semantics = [#tpu.dimension_semantics<parallel>], iteration_bounds = array<i64: 1>, scalar_prefetch = 0 : i64, scratch_operands = 0 : i64, tpu.core_type = #tpu.core_type<tc>, window_params = [{transform_indices = @transform_0, window_bounds = array<i64: 1, 2048>}, {transform_indices = @transform_1, window_bounds = array<i64: 1, 2048>}]} {
    %c0 = arith.constant 0 : index
    %c0_0 = arith.constant 0 : index
    %0 = vector.load %arg1[%c0, %c0_0] : memref<1x2048xf32, #tpu.memory_space<vmem>>, vector<1x2048xf32>
    %cst = arith.constant 0.000000e+00 : f32
    %1 = vector.broadcast %cst : f32 to vector<1x2048xf32>
    %2 = arith.maximumf %0, %1 : vector<1x2048xf32>
    %cst_1 = arith.constant 2.500000e+03 : f32
    %3 = vector.broadcast %cst_1 : f32 to vector<1x2048xf32>
    %4 = arith.mulf %2, %3 : vector<1x2048xf32>
    %5 = math.tanh %4 : vector<1x2048xf32>
    %c0_2 = arith.constant 0 : index
    %c0_3 = arith.constant 0 : index
    %6 = vector.load %arg2[%c0_2, %c0_3] : memref<1x2048xf32, #tpu.memory_space<vmem>>, vector<1x2048xf32>
    tpu.vector_store %arg2[%c0_2, %c0_3], %5 {strides = array<i32>} : memref<1x2048xf32, #tpu.memory_space<vmem>>, vector<1x2048xf32>,
    return
  }
  func.func @transform_0(%arg0: i32) -> (i32, i32) {
    %c0_i32 = arith.constant 0 : i32
    %c0_i32_0 = arith.constant 0 : i32
    return %arg0, %c0_i32 : i32, i32
  }
  func.func @transform_1(%arg0: i32) -> (i32, i32) {
    %c0_i32 = arith.constant 0 : i32
    %c0_i32_0 = arith.constant 0 : i32
    return %arg0, %c0_i32 : i32, i32
  }
}

</mosaic_0001>

<bundles_post_ra>
// kernel: tpu_custom_call.1
= control target key start
LH: loop header
LB: loop body
LE: loop exit
PB: predicated region body
PF: predicated region fallthrough
CT: control target
= control target key end

     0   :  { %6 = vsyncpa [#allocation3], 0  ;;  %s114_s0 = inlined_call_operand.hbm [shape: f32[1,2048], index: 0, kind: input, shape index: {}]   ;;  %s115_s1 = inlined_call_operand.hbm [shape: f32[1,2048], index: 1, kind: output, shape index: {}]  }
   0x1   :  { %7 = vsyncpa [#allocation4], 0  ;;  %s96_s6 = smov [#allocation2]  }
   0x2   :  { %s14_s7 = sshll.u32 %s96_s6, 4  ;;  %s15_s7 = int_to_ptr.vmem [resolvable:$true] %s14_s7 }
   0x3   :  { %s60_s8 = scalar_lea.vmem %s15_s7, 256  ;;  %p65_p1 = scmp.lt.s32.totalorder %s15_s7, %s15_s7 }
   0x4   :  { %p61_p0 = scmp.ne.s32.totalorder %s15_s7, %s60_s8  ;;  %p66_p2 = scmp.lt.s32.totalorder %s60_s8, %s60_s8 }
   0x6   :  { %p67_p3 = por %p66_p2, %p65_p1 }
   0x8   :  { %p68_p4 = pnand %p67_p3, %p61_p0 }
   0xa   :  { %71 = shalt.err (!%p68_p4)
}
   0xb   :  { %17 = dma.hbm_to_vmem [thread:$0]  %s114_s0, 256, %s15_s7, [#allocation3]  }
   0xc   :  { %92 = dma.done.wait [#allocation3], 256  }
   0xd   :  { %93 = vsyncadd [#allocation3], 4294967040  ;;  %v21_v0 = vld [vmem:[#allocation2] sm:$0xff]  ;;  %v22_v1 = vld [vmem:[#allocation2 + $0x8] sm:$0xff]  ;;  %s97_s11 = smov [#allocation5]  }
   0xe   :  { %v23_v2 = vmax.f32 %v21_v0, 0.0  ;;  %v24_v3 = vmax.f32 %v22_v1, 0.0  ;;  %s37_s12 = sshll.u32 %s97_s11, 4  ;;  %s38_s12 = int_to_ptr.vmem [resolvable:$true] %s37_s12 }
   0xf   :  { %s72_s13 = scalar_lea.vmem %s38_s12, 256  ;;  %p77_p6 = scmp.lt.s32.totalorder %s38_s12, %s38_s12 }
  0x10   :  { %v25_v4 = vmul.f32 2500.0, %v23_v2  ;;  %v26_v5 = vmul.f32 2500.0, %v24_v3  ;;  %p73_p5 = scmp.ne.s32.totalorder %s38_s12, %s72_s13  ;;  %p78_p7 = scmp.lt.s32.totalorder %s72_s13, %s72_s13 }
  0x12   :  { %48 = vtanh.f32 %v25_v4  ;;  %p79_p8 = por %p78_p7, %p77_p6 }
  0x13   :  { %50 = vtanh.f32 %v26_v5 }
  0x14   :  { %p80_p9 = pnand %p79_p8, %p73_p5 }
  0x1f   :  { %v49_v6 = vpop.eup %48 }
  0x20   :  { %v51_v7 = vpop.eup %50  ;;  %29 = vst [vmem:[#allocation5] sm:$0xff] %v49_v6 }
  0x21   :  { %30 = vst [vmem:[#allocation5 + $0x8] sm:$0xff] %v51_v7 }
  0x22   :  { %83 = shalt.err (!%p80_p9)
}
  0x23   :  { %40 = dma.vmem_to_hbm [thread:$0]  %s38_s12, 256, %s115_s1, [#allocation4]  }
  0x24   :  { %94 = dma.done.wait [#allocation4], 256  }
  0x25   :  { %95 = vsyncadd [#allocation4], 4294967040 }
  0x26   :  { %44 = vsyncpa [#allocation3], 1 }
  0x27   :  { %45 = vsyncpa [#allocation4], 1 }

</bundles_post_ra>
